<compile_context>
chip_gen: v7x
topology: tpu7x:2x2x1
jax: 0.10.0
libtpu: 0.0.40
codegen_flags: <defaults>
</compile_context>

<pallas_src>
import numpy as np
import jax
import jax.numpy as jnp
from jax.experimental import pallas as pl
from jax.experimental.pallas import tpu as pltpu

# ---- small synthetic SMPL sizes (real SMPL: 6890 verts) ---------------------
NUM_VERTS = 256
NUM_JOINTS = 24
NUM_BETAS = 10
NUM_POSE_FEATS = (NUM_JOINTS - 1) * 9  # 207

PARENT_ARRAY = [0, 0, 0, 0, 1, 2, 3, 4, 5, 6, 7, 8, 9, 9, 9,
                12, 13, 14, 16, 17, 18, 19, 20, 21]
ROOT_INIT_ROTVEC = np.array([np.pi / 2.0, 0.0, 0.0], dtype=np.float32)


# =============================== Pallas kernels ===============================
def _shape_pose_kernel(beta_ref, pf_ref, vt_ref, sd_ref, pd_ref, jrbd_ref,
                       vposed_ref, jrest_ref):
    """Whole batch in one step.

    beta_ref : (B, 10)            pf_ref   : (B, 207)
    vt_ref   : (1, 3V)            sd_ref   : (10, 3V)      pd_ref : (207, 3V)
    jrbd_ref : (3V, 3J)  (block-diagonal J_regressor^T)
    outputs  : vposed (B, 3V) coordinate-major, jrest (B, 3J) coordinate-major.
    """
    ds = jnp.dot(beta_ref[...], sd_ref[...], preferred_element_type=jnp.float32)   # (B, 3V)
    dp = jnp.dot(pf_ref[...], pd_ref[...], preferred_element_type=jnp.float32)     # (B, 3V)
    v_shaped = vt_ref[...] + ds                                                     # (B, 3V)
    jrest_ref[...] = jnp.dot(v_shaped, jrbd_ref[...],
                             preferred_element_type=jnp.float32)                    # (B, 3J)
    vposed_ref[...] = v_shaped + dp


def _lbs_kernel(vp_ref, a_ref, wt_ref, trans_ref, scale_ref, out_ref):
    """Whole batch in one step: linear blend skinning + scale + translation.

    vp_ref   : (3B, V)   row 3b+c = coordinate c of batch b (lane-dense in V)
    a_ref    : (12B, J)  row 12b+4c+d = element [c,d] of the relative 3x4 transform
    wt_ref   : (J, V)    lbs_weights^T
    trans_ref: (B, 3)    SMEM (effective translation, root-centering folded in)
    scale_ref: (1, 1)    SMEM
    out_ref  : (3B, V)   coordinate-major skinned vertices
    """
    nb = vp_ref.shape[0] // 3
    # Per-vertex transform rows for the whole batch on the MXU: (12B, J) @ (J, V) -> (12B, V)
    T = jnp.dot(a_ref[...], wt_ref[...], preferred_element_type=jnp.float32)
    s = scale_ref[0, 0]
    for b in range(nb):                       # unrolled at trace time (B is static)
        x = vp_ref[3 * b + 0:3 * b + 1, :]    # (1, V)
        y = vp_ref[3 * b + 1:3 * b + 2, :]
        z = vp_ref[3 * b + 2:3 * b + 3, :]
        for c in range(3):
            r = 12 * b + 4 * c
            row = (T[r + 0:r + 1, :] * x
                   + T[r + 1:r + 2, :] * y
                   + T[r + 2:r + 3, :] * z
                   + T[r + 3:r + 4, :])
            out_ref[3 * b + c:3 * b + c + 1, :] = row * s + trans_ref[b, c]


# ============================== pallas_call wrappers ==========================
@jax.jit
def shape_pose_pallas(betas, pose_feat, vt_flat, sd_km, pd_km, jr_bd):
    B = betas.shape[0]
    vmem = pl.BlockSpec(memory_space=pltpu.MemorySpace.VMEM)
    return pl.pallas_call(
        _shape_pose_kernel,
        out_shape=(jax.ShapeDtypeStruct((B, 3 * NUM_VERTS), jnp.float32),
                   jax.ShapeDtypeStruct((B, 3 * NUM_JOINTS), jnp.float32)),
        in_specs=[vmem] * 6,
        out_specs=(vmem, vmem),
    )(betas, pose_feat, vt_flat, sd_km, pd_km, jr_bd)


@jax.jit
def lbs_pallas(vp_rows, a_rows, wt, trans_eff, scale_2d):
    rows = vp_rows.shape[0]  # 3B
    vmem = pl.BlockSpec(memory_space=pltpu.MemorySpace.VMEM)
    smem = pl.BlockSpec(memory_space=pltpu.MemorySpace.SMEM)
    return pl.pallas_call(
        _lbs_kernel,
        out_shape=jax.ShapeDtypeStruct((rows, NUM_VERTS), jnp.float32),
        in_specs=[vmem, vmem, vmem, smem, smem],
        out_specs=vmem,
    )(vp_rows, a_rows, wt, trans_eff, scale_2d)


# ================================ JAX glue ====================================
def _rodrigues(rvec):
    """Axis-angle (..., 3) -> rotation matrices (..., 3, 3)."""
    theta = jnp.sqrt(jnp.sum(rvec * rvec, axis=-1, keepdims=True) + 1e-12)
    k = rvec / theta
    kx, ky, kz = k[..., 0], k[..., 1], k[..., 2]
    zero = jnp.zeros_like(kx)
    K = jnp.stack([
        jnp.stack([zero, -kz, ky], axis=-1),
        jnp.stack([kz, zero, -kx], axis=-1),
        jnp.stack([-ky, kx, zero], axis=-1),
    ], axis=-2)
    st = jnp.sin(theta)[..., None]
    ct = jnp.cos(theta)[..., None]
    eye = jnp.eye(3, dtype=rvec.dtype)
    return eye + st * K + (1.0 - ct) * jnp.matmul(K, K)


def _make_tf(R, t):
    # R: (B, 3, 3), t: (B, 3) -> (B, 4, 4)
    B = R.shape[0]
    top = jnp.concatenate([R, t[:, :, None]], axis=-1)
    bottom = jnp.tile(jnp.array([[[0.0, 0.0, 0.0, 1.0]]], dtype=R.dtype), (B, 1, 1))
    return jnp.concatenate([top, bottom], axis=1)


def _forward_kinematics(rotmats, joints, parents):
    # rotmats: (B, 24, 3, 3), joints: (B, 24, 3)
    transforms = [_make_tf(rotmats[:, 0], joints[:, 0])]
    for i in range(1, NUM_JOINTS):
        p = parents[i]
        local = _make_tf(rotmats[:, i], joints[:, i] - joints[:, p])
        transforms.append(jnp.matmul(transforms[p], local))
    G = jnp.stack(transforms, axis=1)          # (B, 24, 4, 4)
    jtr = G[:, :, :3, 3]
    return G, jtr


def _relative_transforms(G, joints):
    B = G.shape[0]
    jh = jnp.concatenate([joints, jnp.zeros((B, NUM_JOINTS, 1), G.dtype)], axis=-1)
    shift = jnp.einsum('bjmn,bjn->bjm', G, jh)                 # (B, 24, 4)
    pad = jnp.concatenate(
        [jnp.zeros((B, NUM_JOINTS, 4, 3), G.dtype), shift[..., None]], axis=-1)
    return G - pad


# ============================== the module ====================================
class SMPLRetargetPallas:
    """JAX/Pallas re-implementation of SMPLRetarget.forward().

    Parameters are initialized deterministically (synthetic SMPL model tensors +
    the module's own pose/trans/shape/scale/offset parameters)."""

    def __init__(self, batch_size, key):
        self.batch_size = batch_size
        km = jax.random.split(key, 8)
        # ---- synthetic SMPL model tensors (stand in for the .pkl model file) ----
        self.v_template = 0.2 * jax.random.normal(km[0], (NUM_VERTS, 3), jnp.float32)
        self.shapedirs = 0.01 * jax.random.normal(km[1], (3, NUM_VERTS, NUM_BETAS), jnp.float32)
        self.posedirs = 0.001 * jax.random.normal(km[2], (3, NUM_VERTS, NUM_POSE_FEATS), jnp.float32)
        self.j_regressor = jax.nn.softmax(
            jax.random.normal(km[3], (NUM_JOINTS, NUM_VERTS), jnp.float32), axis=-1)
        self.lbs_weights = jax.nn.softmax(
            4.0 * jax.random.normal(km[4], (NUM_VERTS, NUM_JOINTS), jnp.float32), axis=-1)

        # ---- kernel-ready (coordinate-major, lane-dense) layouts, built once ----
        # vt_flat[0, c*V + v] = v_template[v, c]
        self.vt_flat = self.v_template.T.reshape(1, 3 * NUM_VERTS)
        # shapedirs_km[k, c*V + v] = shapedirs[c, v, k]
        self.shapedirs_km = self.shapedirs.transpose(2, 0, 1).reshape(NUM_BETAS, 3 * NUM_VERTS)
        self.posedirs_km = self.posedirs.transpose(2, 0, 1).reshape(NUM_POSE_FEATS, 3 * NUM_VERTS)
        # block-diagonal J_regressor^T: (3V, 3J), one (V, J) block per coordinate
        jrT = self.j_regressor.T                                   # (V, J)
        jr_bd = jnp.zeros((3 * NUM_VERTS, 3 * NUM_JOINTS), jnp.float32)
        for c in range(3):
            jr_bd = jr_bd.at[c * NUM_VERTS:(c + 1) * NUM_VERTS,
                             c * NUM_JOINTS:(c + 1) * NUM_JOINTS].set(jrT)
        self.jr_bd = jr_bd
        self.lbs_weights_t = self.lbs_weights.T                    # (J, V)

        # ---- SMPLRetarget parameters (shapes exactly as in __init__) ----
        pose = jnp.zeros((batch_size, 72), jnp.float32)
        pose = pose.at[:, :3].set(jnp.asarray(ROOT_INIT_ROTVEC))
        # small deterministic perturbation so the forward pass is non-degenerate
        self.pose_params = pose + 0.05 * jax.random.normal(km[5], (batch_size, 72), jnp.float32)
        self.trans = 0.1 * jax.random.normal(km[6], (batch_size, 3), jnp.float32)
        self.shape_params = jnp.ones((NUM_BETAS,), jnp.float32)   # cfg.TRAIN.OPTIMIZE_SHAPE
        self.scale = jnp.ones((1,), jnp.float32)
        self.offset = 0.02 * jax.random.normal(km[7], (NUM_JOINTS, 3), jnp.float32)
        self.parents = PARENT_ARRAY
        # TODO(synk): optimizer / LR scheduler / save / load have no forward semantics; omitted.

    def forward(self):
        B = self.batch_size
        betas = jnp.tile(self.shape_params[None, :], (B, 1))        # .repeat(batch, 1)
        rotvecs = self.pose_params.reshape(B, NUM_JOINTS, 3)
        rotmats = _rodrigues(rotvecs)                                # (B, 24, 3, 3)
        pose_feat = (rotmats[:, 1:] - jnp.eye(3, dtype=jnp.float32)).reshape(B, NUM_POSE_FEATS)

        # --- Pallas kernel 1: blend shapes + rest-joint regression (one step, whole batch) ---
        v_posed_flat, j_rest_flat = shape_pose_pallas(
            betas, pose_feat, self.vt_flat, self.shapedirs_km, self.posedirs_km, self.jr_bd)
        j_rest = j_rest_flat.reshape(B, 3, NUM_JOINTS).transpose(0, 2, 1)   # (B, 24, 3)

        # --- forward kinematics (24-joint sequential chain; JAX glue) ---
        G, jtr = _forward_kinematics(rotmats, j_rest, self.parents)
        A = _relative_transforms(G, j_rest)                          # (B, 24, 4, 4)
        # TODO(synk): exact th_offset handling of the custom SMPL_Layer is unavailable;
        # offsets are applied to the rest joints before FK to produce Jtr_offset.
        _, jtr_offset = _forward_kinematics(rotmats, j_rest + self.offset[None], self.parents)

        # smpl_layer(center_idx=0): center by root joint, then scale + trans
        center = jtr[:, 0:1, :]                                      # (B, 1, 3)
        scale = self.scale[0]
        trans_eff = self.trans - center[:, 0, :] * scale             # folds centering into trans

        # --- Pallas kernel 2: LBS + scale + translation (one step, whole batch) ---
        # top-3 rows of each 4x4, arranged row 12b + 4c + d
        a_rows = A[:, :, :3, :].transpose(0, 2, 3, 1).reshape(B * 12, NUM_JOINTS)
        vp_rows = v_posed_flat.reshape(B * 3, NUM_VERTS)             # row 3b + c
        verts_cm = lbs_pallas(vp_rows, a_rows, self.lbs_weights_t,
                              trans_eff, self.scale.reshape(1, 1))   # (3B, V)
        verts = verts_cm.reshape(B, 3, NUM_VERTS).transpose(0, 2, 1) # (B, V, 3)

        jtr_out = (jtr - center) * scale + self.trans[:, None, :]
        jtr_offset_out = (jtr_offset - center) * scale + self.trans[:, None, :]
        return verts, jtr_out, jtr_offset_out


# ============================ pure-JAX reference ==============================
def reference_forward(model):
    B = model.batch_size
    betas = jnp.tile(model.shape_params[None, :], (B, 1))
    rotvecs = model.pose_params.reshape(B, NUM_JOINTS, 3)
    rotmats = _rodrigues(rotvecs)
    pose_feat = (rotmats[:, 1:] - jnp.eye(3, dtype=jnp.float32)).reshape(B, NUM_POSE_FEATS)
    ds = jnp.einsum('cvk,bk->bvc', model.shapedirs, betas)
    dp = jnp.einsum('cvk,bk->bvc', model.posedirs, pose_feat)
    v_shaped = model.v_template[None] + ds
    v_posed = v_shaped + dp
    j_rest = jnp.einsum('jv,bvc->bjc', model.j_regressor, v_shaped)
    G, jtr = _forward_kinematics(rotmats, j_rest, model.parents)
    A = _relative_transforms(G, j_rest)
    _, jtr_offset = _forward_kinematics(rotmats, j_rest + model.offset[None], model.parents)
    T = jnp.einsum('vj,bjmn->bvmn', model.lbs_weights, A)
    vh = jnp.concatenate([v_posed, jnp.ones((B, NUM_VERTS, 1), jnp.float32)], axis=-1)
    v_skinned = jnp.einsum('bvmn,bvn->bvm', T[:, :, :3, :], vh)
    center = jtr[:, 0:1, :]
    scale = model.scale[0]
    verts = (v_skinned - center) * scale + model.trans[:, None, :]
    jtr_out = (jtr - center) * scale + model.trans[:, None, :]
    jtr_off = (jtr_offset - center) * scale + model.trans[:, None, :]
    return verts, jtr_out, jtr_off


# =================================== main =====================================
if __name__ == "__main__":
    key = jax.random.PRNGKey(0)
    model = SMPLRetargetPallas(batch_size=2, key=key)

    verts, jtr, jtr_offset = model.forward()
    jax.block_until_ready((verts, jtr, jtr_offset))

    v_ref, j_ref, jo_ref = reference_forward(model)
    np.testing.assert_allclose(np.asarray(verts), np.asarray(v_ref), rtol=1e-4, atol=1e-4)
    np.testing.assert_allclose(np.asarray(jtr), np.asarray(j_ref), rtol=1e-4, atol=1e-4)
    np.testing.assert_allclose(np.asarray(jtr_offset), np.asarray(jo_ref), rtol=1e-4, atol=1e-4)

    assert verts.shape == (2, NUM_VERTS, 3)
    assert jtr.shape == (2, NUM_JOINTS, 3)
    assert jtr_offset.shape == (2, NUM_JOINTS, 3)
    print("KERNEL_OK")
</pallas_src>

<mosaic_0001>
module attributes {stable_mosaic.version = 11 : i64} {
  func.func @_shape_pose_kernel(%arg0: memref<2x10xf32, #tpu.memory_space<vmem>>, %arg1: memref<2x207xf32, #tpu.memory_space<vmem>>, %arg2: memref<1x768xf32, #tpu.memory_space<vmem>>, %arg3: memref<10x768xf32, #tpu.memory_space<vmem>>, %arg4: memref<207x768xf32, #tpu.memory_space<vmem>>, %arg5: memref<768x72xf32, #tpu.memory_space<vmem>>, %arg6: memref<2x768xf32, #tpu.memory_space<vmem>>, %arg7: memref<2x72xf32, #tpu.memory_space<vmem>>) attributes {dimension_semantics = [], scalar_prefetch = 0 : i64, scratch_operands = 0 : i64, tpu.core_type = #tpu.core_type<tc>} {
    %c0 = arith.constant 0 : index
    %c0_0 = arith.constant 0 : index
    %0 = vector.load %arg0[%c0, %c0_0] : memref<2x10xf32, #tpu.memory_space<vmem>>, vector<2x10xf32>
    %c0_1 = arith.constant 0 : index
    %c0_2 = arith.constant 0 : index
    %1 = vector.load %arg3[%c0_1, %c0_2] : memref<10x768xf32, #tpu.memory_space<vmem>>, vector<10x768xf32>
    %cst = arith.constant dense<0.000000e+00> : vector<2x768xf32>
    %2 = tpu.matmul %0, %1, %cst {dimension_numbers = #tpu.dot_dimension_numbers<[1], [0], [0], [1], [0, 0, 1, 1], [], []>} : vector<2x10xf32>, vector<10x768xf32>, vector<2x768xf32> -> vector<2x768xf32>
    %c0_3 = arith.constant 0 : index
    %c0_4 = arith.constant 0 : index
    %3 = vector.load %arg1[%c0_3, %c0_4] : memref<2x207xf32, #tpu.memory_space<vmem>>, vector<2x207xf32>
    %c0_5 = arith.constant 0 : index
    %c0_6 = arith.constant 0 : index
    %4 = vector.load %arg4[%c0_5, %c0_6] : memref<207x768xf32, #tpu.memory_space<vmem>>, vector<207x768xf32>
    %cst_7 = arith.constant dense<0.000000e+00> : vector<2x768xf32>
    %5 = tpu.matmul %3, %4, %cst_7 {dimension_numbers = #tpu.dot_dimension_numbers<[1], [0], [0], [1], [0, 0, 1, 1], [], []>} : vector<2x207xf32>, vector<207x768xf32>, vector<2x768xf32> -> vector<2x768xf32>
    %c0_8 = arith.constant 0 : index
    %c0_9 = arith.constant 0 : index
    %6 = vector.load %arg2[%c0_8, %c0_9] : memref<1x768xf32, #tpu.memory_space<vmem>>, vector<1x768xf32>
    %7 = vector.broadcast %6 : vector<1x768xf32> to vector<2x768xf32>
    %8 = arith.addf %7, %2 : vector<2x768xf32>
    %c0_10 = arith.constant 0 : index
    %c0_11 = arith.constant 0 : index
    %9 = vector.load %arg5[%c0_10, %c0_11] : memref<768x72xf32, #tpu.memory_space<vmem>>, vector<768x72xf32>
    %cst_12 = arith.constant dense<0.000000e+00> : vector<2x72xf32>
    %10 = tpu.matmul %8, %9, %cst_12 {dimension_numbers = #tpu.dot_dimension_numbers<[1], [0], [0], [1], [0, 0, 1, 1], [], []>} : vector<2x768xf32>, vector<768x72xf32>, vector<2x72xf32> -> vector<2x72xf32>
    %c0_13 = arith.constant 0 : index
    %c0_14 = arith.constant 0 : index
    %11 = vector.load %arg7[%c0_13, %c0_14] : memref<2x72xf32, #tpu.memory_space<vmem>>, vector<2x72xf32>
    tpu.vector_store %arg7[%c0_13, %c0_14], %10 {strides = array<i32>} : memref<2x72xf32, #tpu.memory_space<vmem>>, vector<2x72xf32>,
    %12 = arith.addf %8, %5 : vector<2x768xf32>
    %c0_15 = arith.constant 0 : index
    %c0_16 = arith.constant 0 : index
    %13 = vector.load %arg6[%c0_15, %c0_16] : memref<2x768xf32, #tpu.memory_space<vmem>>, vector<2x768xf32>
    tpu.vector_store %arg6[%c0_15, %c0_16], %12 {strides = array<i32>} : memref<2x768xf32, #tpu.memory_space<vmem>>, vector<2x768xf32>,
    return
  }
}

</mosaic_0001>

<bundles_post_ra>
// kernel: shape_pose_pallas.1
= control target key start
LH: loop header
LB: loop body
LE: loop exit
PB: predicated region body
PF: predicated region fallthrough
CT: control target
= control target key end

     0   :  { %13 = vsyncpa [#allocation3], 0  ;;  %s2106_s0 = inlined_call_operand.vmem [shape: f32[2,10], index: 0, kind: input, shape index: {}]   ;;  %s2107_s1 = inlined_call_operand.vmem [shape: f32[2,207], index: 1, kind: input, shape index: {}]   ;;  %s2108_s2 = inlined_call_operand.vmem [shape: f32[1,768], index: 2, kind: input, shape index: {}]   ;;  %s2109_s3 = inlined_call_operand.vmem [shape: f32[10,768], index: 3, kind: input, shape index: {}]   ;;  %s2110_s4 = inlined_call_operand.hbm [shape: f32[207,768], index: 4, kind: input, shape index: {}]   ;;  %s2111_s5 = inlined_call_operand.vmem [shape: f32[768,72], index: 5, kind: input, shape index: {}]   ;;  %s2112_s6 = inlined_call_operand.hbm [shape: f32[2,768], index: 6, kind: output, shape index: {0}]   ;;  %s2113_s7 = inlined_call_operand.hbm [shape: f32[2,72], index: 7, kind: output, shape index: {1}]  }
   0x1   :  { %14 = vsyncpa [#allocation4], 0 }
   0x2   :  { %15 = vsyncpa [#allocation7], 0  ;;  %s1589_s24 = smov [#allocation2]   ;;  %s1517_s28 = scalar_lea.hbm %s2110_s4, 19968 }
   0x3   :  { %s29_s25 = sshll.u32 %s1589_s24, 4  ;;  %p1518_p0 = scmp.ne.s32.totalorder %s2110_s4, %s1517_s28  ;;  %s30_s25 = int_to_ptr.vmem [resolvable:$true] %s29_s25 }
   0x4   :  { %p1521_p1 = scmp.lt.u32.totalorder %s1517_s28, %s2110_s4 }
   0x6   :  { %p1523_p2 = pnand %p1521_p1, %p1518_p0 }
   0x8   :  { %1526 = shalt.err (!%p1523_p2)
}
   0x9   :  { %s1527_s10 = scalar_lea.vmem %s30_s25, 19968  ;;  %p1532_p4 = scmp.lt.s32.totalorder %s30_s25, %s30_s25 }
   0xa   :  { %p1528_p3 = scmp.ne.s32.totalorder %s30_s25, %s1527_s10  ;;  %p1533_p5 = scmp.lt.s32.totalorder %s1527_s10, %s1527_s10 }
   0xc   :  { %p1534_p6 = por %p1533_p5, %p1532_p4 }
   0xe   :  { %p1535_p7 = pnand %p1534_p6, %p1528_p3 }
  0x10   :  { %1538 = shalt.err (!%p1535_p7)
}
  0x11   :  { %s1590_s11 = smov 768   ;;  %s1591_s12 = smov 48  }
  0x12   :  { %35 = dma.hbm_to_vmem [thread:$0]  %s2110_s4, 19968, %s30_s25, [#allocation3], %s1590_s11, %s1590_s11, %s1591_s12  }
  0x13   :  { %1583 = dma.done.wait [#allocation3], 19968  }
  0x14   :  { %1584 = vsyncadd [#allocation3], 4294947328  ;;  %v1592_v0 = vmov 0.0   ;;  %vm58_vm0 = vcmask 1041408   ;;  %vm1593_vm1 = vmmov 1   ;;  %v43_v2 = vld [vmem:[%s2109_s3 + $0x8] sm:$0xff] }
  0x15   :  { %141 = vmatprep.mubr.f32.mxu0 %v1592_v0  ;;  %vm1651_vm2 = vmpackc.low %vm58_vm0, %vm1593_vm1  ;;  %v49_v3 = vld [vmem:[%s2109_s3 + $0x38] sm:$0x3]  ;;  %v292_v4 = vld [vmem:[#allocation2 + $0x8] sm:$0xff]  ;;  %vm54_vm3 = vcmask 80896   ;;  %vm457_vm4 = vcmask 646144   ;;  %vm460_vm5 = vcmask 1046528  }
  0x16   :  { %v1233_v5 = vpack.c.bf16 %v49_v3, %v43_v2  ;;  %v298_v6 = vld [vmem:[#allocation2 + $0x38] sm:$0xff]  ;;  %v42_v7 = vld [vmem:[%s2109_s3] sm:$0xff]  ;;  %v48_v8 = vld [vmem:[%s2109_s3 + $0x30] sm:$0x3] }
  0x17   :  { %v1251_v9 = vpack.c.bf16 %v298_v6, %v292_v4  ;;  %v1236_v10 = vpack.c.bf16 %v48_v8, %v42_v7  ;;  %v291_v11 = vld [vmem:[#allocation2] sm:$0xff]  ;;  %v297_v12 = vld [vmem:[#allocation2 + $0x30] sm:$0xff]  ;;  %v45_v15 = vld [vmem:[%s2109_s3 + $0x18] sm:$0xff] }
  0x18   :  { %v1670_v13 = vld [vmem:[%s2106_s0] sm:$0x3]  ;;  %1235 = vmatprep.subr.msk.bf16.mxu0 %vm1651_vm2, %v1233_v5  ;;  %v1253_v14 = vpack.c.bf16 %v297_v12, %v291_v11  ;;  %v51_v16 = vld [vmem:[%s2109_s3 + $0x48] sm:$0x3]  ;;  %v310_v19 = vld [vmem:[#allocation2 + $0x98] sm:$0xff] }
  0x19   :  { %v304_v17 = vld [vmem:[#allocation2 + $0x68] sm:$0xff]  ;;  %1252 = vmatprep.subr.bf16.mxu1 %v1251_v9  ;;  %1238 = vmatpush1.bf16.msk.msra.mxu0 %vm1651_vm2, %v1236_v10  ;;  %v1239_v18 = vpack.c.bf16 %v51_v16, %v45_v15  ;;  %v44_v20 = vld [vmem:[%s2109_s3 + $0x10] sm:$0xff]  ;;  %v50_v21 = vld [vmem:[%s2109_s3 + $0x40] sm:$0x3] }
  0x1a   :  { %1254 = vmatpush1.bf16.msra.mxu1 %v1253_v14  ;;  %v1255_v22 = vpack.c.bf16 %v310_v19, %v304_v17  ;;  %v1242_v23 = vpack.c.bf16 %v50_v21, %v44_v20  ;;  %v303_v24 = vld [vmem:[#allocation2 + $0x60] sm:$0xff]  ;;  %v309_v25 = vld [vmem:[#allocation2 + $0x90] sm:$0xff]  ;;  %v47_v26 = vld [vmem:[%s2109_s3 + $0x28] sm:$0xff] }
  0x1b   :  { %1241 = vmatprep.subr.msk.bf16.mxu0 %vm1651_vm2, %v1239_v18  ;;  %v1257_v27 = vpack.c.bf16 %v309_v25, %v303_v24  ;;  %v53_v28 = vld [vmem:[%s2109_s3 + $0x58] sm:$0x3]  ;;  %v316_v29 = vld [vmem:[#allocation2 + $0xc8] sm:$0xff]  ;;  %v46_v33 = vld [vmem:[%s2109_s3 + $0x20] sm:$0xff] }
  0x1c   :  { %v322_v30 = vld [vmem:[#allocation2 + $0xf8] sm:$0xff]  ;;  %1110 = vmatmul.mubr.msk.f32.vlgmr.msra.gmra.mrb[0].mxu0 %vm54_vm3, %v1670_v13  ;;  %1256 = vmatprep.subr.bf16.mxu1 %v1255_v22  ;;  %v1245_v31 = vpack.c.bf16 %v53_v28, %v47_v26  ;;  %v52_v34 = vld [vmem:[%s2109_s3 + $0x50] sm:$0x3]  ;;  %v315_v35 = vld [vmem:[#allocation2 + $0xc0] sm:$0xff] }
  0x1d   :  { %v1259_v32 = vpack.c.bf16 %v322_v30, %v316_v29  ;;  %1244 = vmatpush1.bf16.msk.msra.mxu0 %vm1651_vm2, %v1242_v23  ;;  %212 = vmatprep.mubr.f32.mxu0 %v1592_v0  ;;  %v1248_v36 = vpack.c.bf16 %v52_v34, %v46_v33  ;;  %v321_v37 = vld [vmem:[#allocation2 + $0xf0] sm:$0xff]  ;;  %v328_v38 = vld [vmem:[#allocation2 + $0x128] sm:$0xff]  ;;  %v334_v39 = vld [vmem:[#allocation2 + $0x158] sm:$0xff] }
  0x1e   :  { %1258 = vmatpush1.bf16.msra.mxu1 %v1257_v27  ;;  %1247 = vmatprep.subr.msk.bf16.mxu0 %vm1651_vm2, %v1245_v31  ;;  %v1261_v40 = vpack.c.bf16 %v321_v37, %v315_v35  ;;  %v294_v41 = vld [vmem:[#allocation2 + $0x18] sm:$0xff]  ;;  %v300_v42 = vld [vmem:[#allocation2 + $0x48] sm:$0xff]  ;;  %v327_v43 = vld [vmem:[#allocation2 + $0x120] sm:$0xff]  ;;  %v1263_v44 = vpack.c.bf16 %v334_v39, %v328_v38 }
  0x1f   :  { %1260 = vmatprep.subr.bf16.mxu1 %v1259_v32  ;;  %v1305_v45 = vpack.c.bf16 %v300_v42, %v294_v41  ;;  %v333_v46 = vld [vmem:[#allocation2 + $0x150] sm:$0xff]  ;;  %v299_v48 = vld [vmem:[#allocation2 + $0x40] sm:$0xff]  ;;  %v340_v49 = vld [vmem:[#allocation2 + $0x188] sm:$0xff] }
  0x20   :  { %v293_v47 = vld [vmem:[#allocation2 + $0x10] sm:$0xff]  ;;  %1113 = vmatmul.mubr.msk.f32.vlgmr.msra.gmra.mrb[2].mxu0 %vm54_vm3, %v1670_v13  ;;  %v346_v50 = vld [vmem:[#allocation2 + $0x1b8] sm:$0xff]  ;;  %v312_v53 = vld [vmem:[#allocation2 + $0xa8] sm:$0xff]  ;;  %v1265_v54 = vpack.c.bf16 %v333_v46, %v327_v43 }
  0x21   :  { %v306_v51 = vld [vmem:[#allocation2 + $0x78] sm:$0xff]  ;;  %1250 = vmatpush1.bf16.msk.msra.mxu0 %vm1651_vm2, %v1248_v36  ;;  %283 = vmatprep.mubr.f32.mxu0 %v1592_v0  ;;  %v1307_v52 = vpack.c.bf16 %v299_v48, %v293_v47  ;;  %v339_v56 = vld [vmem:[#allocation2 + $0x180] sm:$0xff]  ;;  %v305_v57 = vld [vmem:[#allocation2 + $0x70] sm:$0xff]  ;;  %v1267_v59 = vpack.c.bf16 %v346_v50, %v340_v49 }
  0x22   :  { %1262 = vmatpush1.bf16.msra.mxu1 %v1261_v40  ;;  %1306 = vmatprep.subr.bf16.mxu0 %v1305_v45  ;;  %v1309_v55 = vpack.c.bf16 %v312_v53, %v306_v51  ;;  %v311_v58 = vld [vmem:[#allocation2 + $0xa0] sm:$0xff]  ;;  %v345_v60 = vld [vmem:[#allocation2 + $0x1b0] sm:$0xff]  ;;  %v318_v61 = vld [vmem:[#allocation2 + $0xd8] sm:$0xff] }
  0x23   :  { %1264 = vmatprep.subr.bf16.mxu1 %v1263_v44  ;;  %v324_v62 = vld [vmem:[#allocation2 + $0x108] sm:$0xff]  ;;  %v358_v1 = vld [vmem:[#allocation2 + $0x218] sm:$0xff]  ;;  %v1311_v0 = vpack.c.bf16 %v311_v58, %v305_v57  ;;  %v1269_v2 = vpack.c.bf16 %v345_v60, %v339_v56  ;;  %v351_v4 = vld [vmem:[#allocation2 + $0x1e0] sm:$0xff] }
  0x24   :  { %1116 = vmatmul.mubr.msk.f32.vlgmr.msra.gmra.mrb[4].mxu0 %vm54_vm3, %v1670_v13  ;;  %v352_v63 = vld [vmem:[#allocation2 + $0x1e8] sm:$0xff]  ;;  %v1313_v3 = vpack.c.bf16 %v324_v62, %v318_v61  ;;  %v317_v5 = vld [vmem:[#allocation2 + $0xd0] sm:$0xff]  ;;  %v323_v6 = vld [vmem:[#allocation2 + $0x100] sm:$0xff] }
  0x25   :  { %1308 = vmatpush1.bf16.msra.mxu0 %v1307_v52  ;;  %v1271_v7 = vpack.c.bf16 %v358_v1, %v352_v63  ;;  %v357_v8 = vld [vmem:[#allocation2 + $0x210] sm:$0xff]  ;;  %v330_v9 = vld [vmem:[#allocation2 + $0x138] sm:$0xff]  ;;  %v336_v10 = vld [vmem:[#allocation2 + $0x168] sm:$0xff]  ;;  %v1315_v13 = vpack.c.bf16 %v323_v6, %v317_v5 }
  0x26   :  { %1266 = vmatpush1.bf16.msra.mxu1 %v1265_v54  ;;  %1310 = vmatprep.subr.bf16.mxu0 %v1309_v55  ;;  %v364_v11 = vld [vmem:[#allocation2 + $0x248] sm:$0xff]  ;;  %v370_v12 = vld [vmem:[#allocation2 + $0x278] sm:$0xff]  ;;  %v1273_v14 = vpack.c.bf16 %v357_v8, %v351_v4  ;;  %v1317_v15 = vpack.c.bf16 %v336_v10, %v330_v9  ;;  %v363_v16 = vld [vmem:[#allocation2 + $0x240] sm:$0xff] }
  0x27   :  { %1268 = vmatprep.subr.bf16.mxu1 %v1267_v59  ;;  %v329_v17 = vld [vmem:[#allocation2 + $0x130] sm:$0xff]  ;;  %v335_v18 = vld [vmem:[#allocation2 + $0x160] sm:$0xff]  ;;  %v1275_v19 = vpack.c.bf16 %v370_v12, %v364_v11  ;;  %v342_v21 = vld [vmem:[#allocation2 + $0x198] sm:$0xff] }
  0x28   :  { %v369_v20 = vld [vmem:[#allocation2 + $0x270] sm:$0xff]  ;;  %v348_v22 = vld [vmem:[#allocation2 + $0x1c8] sm:$0xff]  ;;  %v382_v24 = vld [vmem:[#allocation2 + $0x2d8] sm:$0xff]  ;;  %v1319_v25 = vpack.c.bf16 %v335_v18, %v329_v17 }
  0x29   :  { %1312 = vmatpush1.bf16.msra.mxu0 %v1311_v0  ;;  %v376_v23 = vld [vmem:[#allocation2 + $0x2a8] sm:$0xff]  ;;  %v1277_v26 = vpack.c.bf16 %v369_v20, %v363_v16  ;;  %v1321_v27 = vpack.c.bf16 %v348_v22, %v342_v21  ;;  %v375_v28 = vld [vmem:[#allocation2 + $0x2a0] sm:$0xff]  ;;  %v341_v29 = vld [vmem:[#allocation2 + $0x190] sm:$0xff] }
  0x2a   :  { %1270 = vmatpush1.bf16.msra.mxu1 %v1269_v2  ;;  %1314 = vmatprep.subr.bf16.mxu0 %v1313_v3  ;;  %v347_v30 = vld [vmem:[#allocation2 + $0x1c0] sm:$0xff]  ;;  %v1279_v31 = vpack.c.bf16 %v382_v24, %v376_v23  ;;  %v381_v32 = vld [vmem:[#allocation2 + $0x2d0] sm:$0xff]  ;;  %v354_v33 = vld [vmem:[#allocation2 + $0x1f8] sm:$0xff] }
  0x2b   :  { %1272 = vmatprep.subr.bf16.mxu1 %v1271_v7  ;;  %v360_v34 = vld [vmem:[#allocation2 + $0x228] sm:$0xff]  ;;  %v394_v36 = vld [vmem:[#allocation2 + $0x338] sm:$0xff]  ;;  %v1323_v37 = vpack.c.bf16 %v347_v30, %v341_v29  ;;  %v1281_v38 = vpack.c.bf16 %v381_v32, %v375_v28  ;;  %v387_v40 = vld [vmem:[#allocation2 + $0x300] sm:$0xff] }
  0x2c   :  { %v388_v35 = vld [vmem:[#allocation2 + $0x308] sm:$0xff]  ;;  %v1325_v39 = vpack.c.bf16 %v360_v34, %v354_v33  ;;  %v353_v41 = vld [vmem:[#allocation2 + $0x1f0] sm:$0xff]  ;;  %v359_v42 = vld [vmem:[#allocation2 + $0x220] sm:$0xff] }
  0x2d   :  { %1316 = vmatpush1.bf16.msra.mxu0 %v1315_v13  ;;  %v1283_v43 = vpack.c.bf16 %v394_v36, %v388_v35  ;;  %v393_v44 = vld [vmem:[#allocation2 + $0x330] sm:$0xff]  ;;  %v366_v45 = vld [vmem:[#allocation2 + $0x258] sm:$0xff]  ;;  %v372_v46 = vld [vmem:[#allocation2 + $0x288] sm:$0xff]  ;;  %v1327_v49 = vpack.c.bf16 %v359_v42, %v353_v41 }
  0x2e   :  { %1274 = vmatpush1.bf16.msra.mxu1 %v1273_v14  ;;  %1318 = vmatprep.subr.bf16.mxu0 %v1317_v15  ;;  %v400_v47 = vld [vmem:[#allocation2 + $0x368] sm:$0xff]  ;;  %v406_v48 = vld [vmem:[#allocation2 + $0x398] sm:$0xff]  ;;  %v1285_v50 = vpack.c.bf16 %v393_v44, %v387_v40  ;;  %v1329_v51 = vpack.c.bf16 %v372_v46, %v366_v45  ;;  %v399_v52 = vld [vmem:[#allocation2 + $0x360] sm:$0xff] }
  0x2f   :  { %1276 = vmatprep.subr.bf16.mxu1 %v1275_v19  ;;  %v365_v53 = vld [vmem:[#allocation2 + $0x250] sm:$0xff]  ;;  %v371_v54 = vld [vmem:[#allocation2 + $0x280] sm:$0xff]  ;;  %v1287_v55 = vpack.c.bf16 %v406_v48, %v400_v47  ;;  %v378_v57 = vld [vmem:[#allocation2 + $0x2b8] sm:$0xff] }
  0x30   :  { %v405_v56 = vld [vmem:[#allocation2 + $0x390] sm:$0xff]  ;;  %v384_v58 = vld [vmem:[#allocation2 + $0x2e8] sm:$0xff]  ;;  %v418_v60 = vld [vmem:[#allocation2 + $0x3f8] sm:$0xff]  ;;  %v1331_v62 = vpack.c.bf16 %v371_v54, %v365_v53 }
  0x31   :  { %1320 = vmatpush1.bf16.msra.mxu0 %v1319_v25  ;;  %v412_v59 = vld [vmem:[#allocation2 + $0x3c8] sm:$0xff]  ;;  %v1719_v61 = vld.sshfl [vmem:[%s2107_s1] sm:$0x33 pattern:$0x76325410]  ;;  %v1289_v1 = vpack.c.bf16 %v405_v56, %v399_v52  ;;  %v1333_v0 = vpack.c.bf16 %v384_v58, %v378_v57  ;;  %v377_v3 = vld [vmem:[#allocation2 + $0x2b0] sm:$0xff] }
  0x32   :  { %1278 = vmatpush1.bf16.msra.mxu1 %v1277_v26  ;;  %1322 = vmatprep.subr.bf16.mxu0 %v1321_v27  ;;  %v1723_v63 = vcombine.high %v1719_v61, %v1719_v61  ;;  %v411_v2 = vld [vmem:[#allocation2 + $0x3c0] sm:$0xff]  ;;  %v1291_v5 = vpack.c.bf16 %v418_v60, %v412_v59  ;;  %v417_v6 = vld [vmem:[#allocation2 + $0x3f0] sm:$0xff]  ;;  %v390_v7 = vld [vmem:[#allocation2 + $0x318] sm:$0xff] }
  0x33   :  { %1280 = vmatprep.subr.bf16.mxu1 %v1279_v31  ;;  %v383_v4 = vld [vmem:[#allocation2 + $0x2e0] sm:$0xff]  ;;  %v396_v8 = vld [vmem:[#allocation2 + $0x348] sm:$0xff]  ;;  %v430_v10 = vld [vmem:[#allocation2 + $0x458] sm:$0xff]  ;;  %v1293_v12 = vpack.c.bf16 %v417_v6, %v411_v2 }
  0x34   :  { %1120 = vmatprep.mubr.msk.f32.mxu1 %vm457_vm4, %v1723_v63  ;;  %v424_v9 = vld [vmem:[#allocation2 + $0x428] sm:$0xff]  ;;  %1123 = vmatprep.mubr.msk.f32.mxu0 %vm457_vm4, %v1723_v63  ;;  %v1335_v11 = vpack.c.bf16 %v383_v4, %v377_v3  ;;  %v1337_v13 = vpack.c.bf16 %v396_v8, %v390_v7  ;;  %v423_v14 = vld [vmem:[#allocation2 + $0x420] sm:$0xff]  ;;  %v389_v15 = vld [vmem:[#allocation2 + $0x310] sm:$0xff] }
  0x35   :  { %1324 = vmatpush1.bf16.msra.mxu0 %v1323_v37  ;;  %v395_v16 = vld [vmem:[#allocation2 + $0x340] sm:$0xff]  ;;  %v1295_v17 = vpack.c.bf16 %v430_v10, %v424_v9  ;;  %v429_v18 = vld [vmem:[#allocation2 + $0x450] sm:$0xff]  ;;  %v402_v19 = vld [vmem:[#allocation2 + $0x378] sm:$0xff] }
  0x36   :  { %1282 = vmatpush1.bf16.msra.mxu1 %v1281_v38  ;;  %1326 = vmatprep.subr.bf16.mxu0 %v1325_v39  ;;  %v408_v20 = vld [vmem:[#allocation2 + $0x3a8] sm:$0xff]  ;;  %v442_v22 = vld [vmem:[#allocation2 + $0x4b8] sm:$0x7f]  ;;  %v1339_v23 = vpack.c.bf16 %v395_v16, %v389_v15  ;;  %v1297_v24 = vpack.c.bf16 %v429_v18, %v423_v14  ;;  %v435_v26 = vld [vmem:[#allocation2 + $0x480] sm:$0xff] }
  0x37   :  { %1284 = vmatprep.subr.bf16.mxu1 %v1283_v43  ;;  %v436_v21 = vld [vmem:[#allocation2 + $0x488] sm:$0xff]  ;;  %v1341_v25 = vpack.c.bf16 %v408_v20, %v402_v19  ;;  %v401_v27 = vld [vmem:[#allocation2 + $0x370] sm:$0xff]  ;;  %v407_v28 = vld [vmem:[#allocation2 + $0x3a0] sm:$0xff] }
  0x38   :  { %v1299_v29 = vpack.c.bf16 %v442_v22, %v436_v21  ;;  %v441_v30 = vld [vmem:[#allocation2 + $0x4b0] sm:$0x7f]  ;;  %v414_v31 = vld [vmem:[#allocation2 + $0x3d8] sm:$0xff]  ;;  %v420_v32 = vld [vmem:[#allocation2 + $0x408] sm:$0xff]  ;;  %v1343_v36 = vpack.c.bf16 %v407_v28, %v401_v27 }
  0x39   :  { %1328 = vmatpush1.bf16.msra.mxu0 %v1327_v49  ;;  %vm1730_vm6 = vmpackc.low %vm460_vm5, %vm1593_vm1  ;;  %v296_v34 = vld [vmem:[#allocation2 + $0x28] sm:$0xff]  ;;  %v302_v35 = vld [vmem:[#allocation2 + $0x58] sm:$0xff]  ;;  %v1302_v37 = vpack.c.bf16 %v441_v30, %v435_v26  ;;  %v1345_v38 = vpack.c.bf16 %v420_v32, %v414_v31 }
  0x3a   :  { %1286 = vmatpush1.bf16.msra.mxu1 %v1285_v50  ;;  %1330 = vmatprep.subr.bf16.mxu0 %v1329_v51  ;;  %v413_v39 = vld [vmem:[#allocation2 + $0x3d0] sm:$0xff]  ;;  %v419_v40 = vld [vmem:[#allocation2 + $0x400] sm:$0xff]  ;;  %v1359_v42 = vpack.c.bf16 %v302_v35, %v296_v34  ;;  %v426_v44 = vld [vmem:[#allocation2 + $0x438] sm:$0xff] }
  0x3b   :  { %1288 = vmatprep.subr.bf16.mxu1 %v1287_v55  ;;  %v295_v41 = vld [vmem:[#allocation2 + $0x20] sm:$0xff]  ;;  %v301_v43 = vld [vmem:[#allocation2 + $0x50] sm:$0xff]  ;;  %v432_v45 = vld [vmem:[#allocation2 + $0x468] sm:$0xff]  ;;  %v1347_v48 = vpack.c.bf16 %v419_v40, %v413_v39 }
  0x3c   :  { %v308_v46 = vld [vmem:[#allocation2 + $0x88] sm:$0xff]  ;;  %v314_v47 = vld [vmem:[#allocation2 + $0xb8] sm:$0xff]  ;;  %v1361_v49 = vpack.c.bf16 %v301_v43, %v295_v41  ;;  %v1349_v50 = vpack.c.bf16 %v432_v45, %v426_v44  ;;  %v425_v51 = vld [vmem:[#allocation2 + $0x430] sm:$0xff] }
  0x3d   :  { %1332 = vmatpush1.bf16.msra.mxu0 %v1331_v62  ;;  %v431_v52 = vld [vmem:[#allocation2 + $0x460] sm:$0xff]  ;;  %v1363_v54 = vpack.c.bf16 %v314_v47, %v308_v46  ;;  %v313_v55 = vld [vmem:[#allocation2 + $0xb0] sm:$0xff]  ;;  %v438_v56 = vld [vmem:[#allocation2 + $0x498] sm:$0xff] }
  0x3e   :  { %1290 = vmatpush1.bf16.msra.mxu1 %v1289_v1  ;;  %1334 = vmatprep.subr.bf16.mxu0 %v1333_v0  ;;  %v307_v53 = vld [vmem:[#allocation2 + $0x80] sm:$0xff]  ;;  %v444_v57 = vld [vmem:[#allocation2 + $0x4c8] sm:$0x7f]  ;;  %v326_v59 = vld [vmem:[#allocation2 + $0x118] sm:$0xff]  ;;  %v1351_v60 = vpack.c.bf16 %v431_v52, %v425_v51 }
  0x3f   :  { %1292 = vmatprep.subr.bf16.mxu1 %v1291_v5  ;;  %v320_v58 = vld [vmem:[#allocation2 + $0xe8] sm:$0xff]  ;;  %v1365_v62 = vpack.c.bf16 %v313_v55, %v307_v53  ;;  %v1353_v1 = vpack.c.bf16 %v444_v57, %v438_v56  ;;  %v437_v0 = vld [vmem:[#allocation2 + $0x490] sm:$0xff]  ;;  %v443_v2 = vld [vmem:[#allocation2 + $0x4c0] sm:$0x7f] }
  0x40   :  { %v319_v3 = vld [vmem:[#allocation2 + $0xe0] sm:$0xff]  ;;  %v1367_v4 = vpack.c.bf16 %v326_v59, %v320_v58  ;;  %v325_v5 = vld [vmem:[#allocation2 + $0x110] sm:$0xff]  ;;  %v747_v7 = vld [vmem:[%s2111_s5 + $0x88] sm:$0xff]  ;;  %v1356_v10 = vpack.c.bf16 %v443_v2, %v437_v0 }
  0x41   :  { %1336 = vmatpush1.bf16.msra.mxu0 %v1335_v11  ;;  %v746_v6 = vld [vmem:[%s2111_s5 + $0x80] sm:$0xff]  ;;  %v332_v8 = vld [vmem:[#allocation2 + $0x148] sm:$0xff]  ;;  %v338_v9 = vld [vmem:[#allocation2 + $0x178] sm:$0xff]  ;;  %v1369_v11 = vpack.c.bf16 %v325_v5, %v319_v3 }
  0x42   :  { %1294 = vmatpush1.bf16.msra.mxu1 %v1293_v12  ;;  %1338 = vmatprep.subr.bf16.mxu0 %v1337_v13  ;;  %v331_v12 = vld [vmem:[#allocation2 + $0x140] sm:$0xff]  ;;  %v1413_v13 = vpack.c.bf16 %v747_v7, %v746_v6  ;;  %v731_v14 = vld [vmem:[%s2111_s5 + $0x8] sm:$0xff]  ;;  %v1371_v15 = vpack.c.bf16 %v338_v9, %v332_v8  ;;  %v337_v16 = vld [vmem:[#allocation2 + $0x170] sm:$0xff] }
  0x43   :  { %1296 = vmatprep.subr.bf16.mxu1 %v1295_v17  ;;  %v748_v17 = vld [vmem:[%s2111_s5 + $0x90] sm:$0xff]  ;;  %v749_v18 = vld [vmem:[%s2111_s5 + $0x98] sm:$0xff]  ;;  %v344_v19 = vld [vmem:[#allocation2 + $0x1a8] sm:$0xff]  ;;  %v1373_v22 = vpack.c.bf16 %v337_v16, %v331_v12 }
  0x44   :  { %v350_v20 = vld [vmem:[#allocation2 + $0x1d8] sm:$0xff]  ;;  %v349_v28 = vld [vmem:[#allocation2 + $0x1d0] sm:$0xff]  ;;  %v751_v30 = vld [vmem:[%s2111_s5 + $0xa8] sm:$0xff] }
  0x45   :  { %1340 = vmatpush1.bf16.msra.mxu0 %v1339_v23  ;;  %v343_v23 = vld [vmem:[#allocation2 + $0x1a0] sm:$0xff]  ;;  %v733_v26 = vld [vmem:[%s2111_s5 + $0x18] sm:$0xff]  ;;  %v1375_v27 = vpack.c.bf16 %v350_v20, %v344_v19  ;;  %v356_v31 = vld [vmem:[#allocation2 + $0x208] sm:$0xff] }
  0x46   :  { %1298 = vmatpush1.bf16.msra.mxu1 %v1297_v24  ;;  %1342 = vmatprep.subr.bf16.mxu0 %v1341_v25  ;;  %v1417_v24 = vpack.c.bf16 %v749_v18, %v748_v17  ;;  %v732_v25 = vld [vmem:[%s2111_s5 + $0x10] sm:$0xff]  ;;  %v362_v32 = vld [vmem:[#allocation2 + $0x238] sm:$0xff]  ;;  %v1377_v35 = vpack.c.bf16 %v349_v28, %v343_v23  ;;  %v735_v39 = vld [vmem:[%s2111_s5 + $0x28] sm:$0xff] }
  0x47   :  { %1301 = vmatprep.subr.msk.bf16.mxu1 %vm1730_vm6, %v1299_v29  ;;  %v750_v29 = vld [vmem:[%s2111_s5 + $0xa0] sm:$0xff]  ;;  %v1419_v34 = vpack.c.bf16 %v733_v26, %v732_v25  ;;  %v1379_v40 = vpack.c.bf16 %v362_v32, %v356_v31  ;;  %v361_v41 = vld [vmem:[#allocation2 + $0x230] sm:$0xff]  ;;  %v753_v43 = vld [vmem:[%s2111_s5 + $0xb8] sm:$0xff] }
  0x48   :  { %v368_v44 = vld [vmem:[#allocation2 + $0x268] sm:$0xff]  ;;  %v374_v45 = vld [vmem:[#allocation2 + $0x298] sm:$0xff]  ;;  %v373_v53 = vld [vmem:[#allocation2 + $0x290] sm:$0xff] }
  0x49   :  { %1344 = vmatpush1.bf16.msra.mxu0 %v1343_v36  ;;  %v355_v36 = vld [vmem:[#allocation2 + $0x200] sm:$0xff]  ;;  %v737_v51 = vld [vmem:[%s2111_s5 + $0x38] sm:$0xff]  ;;  %v1383_v52 = vpack.c.bf16 %v374_v45, %v368_v44  ;;  %v755_v55 = vld [vmem:[%s2111_s5 + $0xc8] sm:$0xff] }
  0x4a   :  { %1304 = vmatpush1.bf16.msk.msra.mxu1 %vm1730_vm6, %v1302_v37  ;;  %1346 = vmatprep.subr.bf16.mxu0 %v1345_v38  ;;  %v1421_v37 = vpack.c.bf16 %v751_v30, %v750_v29  ;;  %v734_v38 = vld [vmem:[%s2111_s5 + $0x20] sm:$0xff]  ;;  %v1381_v47 = vpack.c.bf16 %v361_v41, %v355_v36  ;;  %v380_v56 = vld [vmem:[#allocation2 + $0x2c8] sm:$0xff]  ;;  %v386_v57 = vld [vmem:[#allocation2 + $0x2f8] sm:$0xff] }
  0x4b   :  { %1360 = vmatprep.subr.bf16.mxu1 %v1359_v42  ;;  %v752_v42 = vld [vmem:[%s2111_s5 + $0xb0] sm:$0xff]  ;;  %v1423_v46 = vpack.c.bf16 %v735_v39, %v734_v38  ;;  %v739_v0 = vld [vmem:[%s2111_s5 + $0x48] sm:$0xff]  ;;  %v1387_v2 = vpack.c.bf16 %v386_v57, %v380_v56  ;;  %v757_v5 = vld [vmem:[%s2111_s5 + $0xd8] sm:$0xff] }
  0x4c   :  { %v385_v3 = vld [vmem:[#allocation2 + $0x2f0] sm:$0xff]  ;;  %v392_v6 = vld [vmem:[#allocation2 + $0x328] sm:$0xff]  ;;  %v398_v7 = vld [vmem:[#allocation2 + $0x358] sm:$0xff] }
  0x4d   :  { %544 = vmatmul.mubr.f32.vlgmr.msra.gmra.mrb[0].mxu1 %v1719_v61  ;;  %1348 = vmatpush1.bf16.msra.mxu0 %v1347_v48  ;;  %v367_v48 = vld [vmem:[#allocation2 + $0x260] sm:$0xff]  ;;  %v740_v12 = vld [vmem:[%s2111_s5 + $0x50] sm:$0xff]  ;;  %v759_v16 = vld [vmem:[%s2111_s5 + $0xe8] sm:$0xff] }
  0x4e   :  { %1362 = vmatpush1.bf16.msra.mxu1 %v1361_v49  ;;  %1350 = vmatprep.subr.bf16.mxu0 %v1349_v50  ;;  %v1425_v49 = vpack.c.bf16 %v753_v43, %v752_v42  ;;  %v736_v50 = vld [vmem:[%s2111_s5 + $0x30] sm:$0xff]  ;;  %v1385_v59 = vpack.c.bf16 %v373_v53, %v367_v48  ;;  %v404_v17 = vld [vmem:[#allocation2 + $0x388] sm:$0xff]  ;;  %v410_v18 = vld [vmem:[#allocation2 + $0x3b8] sm:$0xff] }
  0x4f   :  { %1364 = vmatprep.subr.bf16.mxu1 %v1363_v54  ;;  %1126 = vmatprep.mubr.msk.f32.mxu1 %vm457_vm4, %v1723_v63  ;;  %v730_v63 = vld [vmem:[%s2111_s5] sm:$0xff]  ;;  %v1427_v58 = vpack.c.bf16 %v737_v51, %v736_v50  ;;  %v743_v23 = vld [vmem:[%s2111_s5 + $0x68] sm:$0xff]  ;;  %v409_v26 = vld [vmem:[#allocation2 + $0x3b0] sm:$0xff] }
  0x50   :  { %v1415_v21 = vpack.c.bf16 %v731_v14, %v730_v63  ;;  %v754_v54 = vld [vmem:[%s2111_s5 + $0xc0] sm:$0xff]  ;;  %v1391_v63 = vpack.c.bf16 %v398_v7, %v392_v6  ;;  %v397_v14 = vld [vmem:[#allocation2 + $0x350] sm:$0xff]  ;;  %v422_v28 = vld [vmem:[#allocation2 + $0x418] sm:$0xff] }
  0x51   :  { %1352 = vmatpush1.bf16.msra.mxu0 %v1351_v60  ;;  %v379_v60 = vld [vmem:[#allocation2 + $0x2c0] sm:$0xff]  ;;  %v760_v30 = vld [vmem:[%s2111_s5 + $0xf0] sm:$0xff]  ;;  %v761_v31 = vld [vmem:[%s2111_s5 + $0xf8] sm:$0xff] }
  0x52   :  { %1366 = vmatpush1.bf16.msra.mxu1 %v1365_v62  ;;  %1355 = vmatprep.subr.msk.bf16.mxu0 %vm1730_vm6, %v1353_v1  ;;  %v1429_v62 = vpack.c.bf16 %v755_v55, %v754_v54  ;;  %v738_v1 = vld [vmem:[%s2111_s5 + $0x40] sm:$0xff]  ;;  %v1389_v9 = vpack.c.bf16 %v385_v3, %v379_v60  ;;  %v745_v36 = vld [vmem:[%s2111_s5 + $0x78] sm:$0xff]  ;;  %v421_v39 = vld [vmem:[#allocation2 + $0x410] sm:$0xff] }
  0x53   :  { %1368 = vmatprep.subr.bf16.mxu1 %v1367_v4  ;;  %v756_v4 = vld [vmem:[%s2111_s5 + $0xd0] sm:$0xff]  ;;  %v1431_v8 = vpack.c.bf16 %v739_v0, %v738_v1  ;;  %v403_v25 = vld [vmem:[#allocation2 + $0x380] sm:$0xff]  ;;  %v434_v41 = vld [vmem:[#allocation2 + $0x478] sm:$0xff] }
  0x54   :  { %v1397_v32 = vpack.c.bf16 %v409_v26, %v403_v25  ;;  %v415_v38 = vld [vmem:[#allocation2 + $0x3e0] sm:$0xff]  ;;  %v779_v44 = vld [vmem:[%s2111_s5 + $0x188] sm:$0xff]  ;;  %v446_v51 = vld [vmem:[#allocation2 + $0x4d8] sm:$0x7f] }
  0x55   :  { %1358 = vmatpush1.bf16.msk.msra.mxu0 %vm1730_vm6, %v1356_v10  ;;  %v391_v10 = vld [vmem:[#allocation2 + $0x320] sm:$0xff]  ;;  %v1401_v45 = vpack.c.bf16 %v421_v39, %v415_v38  ;;  %v440_v50 = vld [vmem:[#allocation2 + $0x4a8] sm:$0xff]  ;;  %v445_v55 = vld [vmem:[#allocation2 + $0x4d0] sm:$0x7f] }
  0x56   :  { %1370 = vmatpush1.bf16.msra.mxu1 %v1369_v11  ;;  %1414 = vmatprep.subr.bf16.mxu0 %v1413_v13  ;;  %v1433_v11 = vpack.c.bf16 %v757_v5, %v756_v4  ;;  %v741_v13 = vld [vmem:[%s2111_s5 + $0x58] sm:$0xff]  ;;  %v1393_v20 = vpack.c.bf16 %v397_v14, %v391_v10  ;;  %v778_v43 = vld [vmem:[%s2111_s5 + $0x180] sm:$0xff]  ;;  %v1407_v53 = vpack.c.bf16 %v446_v51, %v440_v50  ;;  %v811_v57 = vld [vmem:[%s2111_s5 + $0x288] sm:$0xff] }
  0x57   :  { %1372 = vmatprep.subr.bf16.mxu1 %v1371_v15  ;;  %v758_v15 = vld [vmem:[%s2111_s5 + $0xe0] sm:$0xff]  ;;  %v1435_v19 = vpack.c.bf16 %v741_v13, %v740_v12  ;;  %v812_v1 = vld [vmem:[%s2111_s5 + $0x290] sm:$0xff]  ;;  %v813_v0 = vld [vmem:[%s2111_s5 + $0x298] sm:$0xff] }
  0x58   :  { %615 = vmatmul.mubr.f32.vlgmr.msra.gmra.mrb[6].mxu0 %v1719_v61  ;;  %v427_v48 = vld [vmem:[#allocation2 + $0x440] sm:$0xff]  ;;  %v1481_v3 = vpack.c.bf16 %v813_v0, %v812_v1  ;;  %v796_v4 = vld [vmem:[%s2111_s5 + $0x210] sm:$0xff]  ;;  %v797_v5 = vld [vmem:[%s2111_s5 + $0x218] sm:$0xff] }
  0x59   :  { %1416 = vmatpush3.bf16.msra.mxu0 %v1415_v21  ;;  %v1437_v21 = vpack.c.bf16 %v759_v16, %v758_v15  ;;  %v439_v54 = vld [vmem:[#allocation2 + $0x4a0] sm:$0xff]  ;;  %v815_v33 = vld [vmem:[%s2111_s5 + $0x2a8] sm:$0xff]  ;;  %v1483_v7 = vpack.c.bf16 %v797_v5, %v796_v4  ;;  %v801_v14 = vld [vmem:[%s2111_s5 + $0x238] sm:$0xff] }
  0x5a   :  { %1374 = vmatpush1.bf16.msra.mxu1 %v1373_v22  ;;  %1418 = vmatprep.subr.bf16.mxu0 %v1417_v24  ;;  %v742_v22 = vld [vmem:[%s2111_s5 + $0x60] sm:$0xff]  ;;  %v1395_v24 = vpack.c.bf16 %v410_v18, %v404_v17  ;;  %v799_v10 = vld [vmem:[%s2111_s5 + $0x228] sm:$0xff]  ;;  %v804_v25 = vld [vmem:[%s2111_s5 + $0x250] sm:$0xff] }
  0x5b   :  { %1376 = vmatprep.subr.bf16.mxu1 %v1375_v27  ;;  %v416_v27 = vld [vmem:[#allocation2 + $0x3e8] sm:$0xff]  ;;  %v1439_v29 = vpack.c.bf16 %v743_v23, %v742_v22  ;;  %v810_v56 = vld [vmem:[%s2111_s5 + $0x280] sm:$0xff]  ;;  %v821_v22 = vld [vmem:[%s2111_s5 + $0x2d8] sm:$0xff] }
  0x5c   :  { %v794_v60 = vld [vmem:[%s2111_s5 + $0x200] sm:$0xff]  ;;  %v819_v16 = vld [vmem:[%s2111_s5 + $0x2c8] sm:$0xff]  ;;  %v805_v26 = vld [vmem:[%s2111_s5 + $0x258] sm:$0xff] }
  0x5d   :  { %1420 = vmatpush3.bf16.msra.mxu0 %v1419_v34  ;;  %v1441_v34 = vpack.c.bf16 %v761_v31, %v760_v30  ;;  %v814_v6 = vld [vmem:[%s2111_s5 + $0x2a0] sm:$0xff]  ;;  %v808_v38 = vld [vmem:[%s2111_s5 + $0x270] sm:$0xff]  ;;  %v809_v39 = vld [vmem:[%s2111_s5 + $0x278] sm:$0xff] }
  0x5e   :  { %1378 = vmatpush1.bf16.msra.mxu1 %v1377_v35  ;;  %1422 = vmatprep.subr.bf16.mxu0 %v1421_v37  ;;  %v744_v35 = vld [vmem:[%s2111_s5 + $0x70] sm:$0xff]  ;;  %v1399_v37 = vpack.c.bf16 %v422_v28, %v416_v27  ;;  %v818_v15 = vld [vmem:[%s2111_s5 + $0x2c0] sm:$0xff]  ;;  %v823_v28 = vld [vmem:[%s2111_s5 + $0x2e8] sm:$0xff] }
  0x5f   :  { %1380 = vmatprep.subr.bf16.mxu1 %v1379_v40  ;;  %v428_v40 = vld [vmem:[#allocation2 + $0x448] sm:$0xff]  ;;  %v1443_v42 = vpack.c.bf16 %v745_v36, %v744_v35  ;;  %v1493_v18 = vpack.c.bf16 %v819_v16, %v818_v15  ;;  %v822_v27 = vld [vmem:[%s2111_s5 + $0x2e0] sm:$0xff]  ;;  %v825_v35 = vld [vmem:[%s2111_s5 + $0x2f8] sm:$0xff] }
  0x60   :  { %v1501_v30 = vpack.c.bf16 %v823_v28, %v822_v27  ;;  %v806_v31 = vld [vmem:[%s2111_s5 + $0x260] sm:$0xff]  ;;  %v763_v50 = vld [vmem:[%s2111_s5 + $0x108] sm:$0xff]  ;;  %v764_v1 = vld [vmem:[%s2111_s5 + $0x110] sm:$0xff] }
  0x61   :  { %1424 = vmatpush3.bf16.msra.mxu0 %v1423_v46  ;;  %v1445_v46 = vpack.c.bf16 %v779_v44, %v778_v43  ;;  %v1955_v44 = vld [vmem:[%s2108_s2] sm:$0x3f]  ;;  %v765_v0 = vld [vmem:[%s2111_s5 + $0x118] sm:$0xff] }
  0x62   :  { %1382 = vmatpush1.bf16.msra.mxu1 %v1381_v47  ;;  %1426 = vmatprep.subr.bf16.mxu0 %v1425_v49  ;;  %v1403_v47 = vpack.c.bf16 %v434_v41, %v428_v40  ;;  %v433_v49 = vld [vmem:[#allocation2 + $0x470] sm:$0xff]  ;;  %v1507_v40 = vpack.c.bf16 %v809_v39, %v808_v38  ;;  %v694_v41 = vlaneseq  ;;  %v789_v27 = vld [vmem:[%s2111_s5 + $0x1d8] sm:$0xff]  ;;  %v775_v38 = vld [vmem:[%s2111_s5 + $0x168] sm:$0xff] }
  0x63   :  { %1384 = vmatprep.subr.bf16.mxu1 %v1383_v52  ;;  %v1405_v52 = vpack.c.bf16 %v433_v49, %v427_v48  ;;  %v762_v49 = vld [vmem:[%s2111_s5 + $0x100] sm:$0xff]  ;;  %v792_v39 = vld [vmem:[%s2111_s5 + $0x1f0] sm:$0xff] }
  0x65   :  { %1428 = vmatpush3.bf16.msra.mxu0 %v1427_v58  ;;  %v1410_v58 = vpack.c.bf16 %v445_v55, %v439_v54 }
  0x66   :  { %1386 = vmatpush1.bf16.msra.mxu1 %v1385_v59  ;;  %1430 = vmatprep.subr.bf16.mxu0 %v1429_v62  ;;  %v1477_v59 = vpack.c.bf16 %v811_v57, %v810_v56  ;;  %v795_v62 = vld [vmem:[%s2111_s5 + $0x208] sm:$0xff]  ;;  %v1447_v57 = vpack.c.bf16 %v763_v50, %v762_v49 }
  0x67   :  { %1388 = vmatprep.subr.bf16.mxu1 %v1387_v2  ;;  %v1479_v2 = vpack.c.bf16 %v795_v62, %v794_v60 }
  0x69   :  { %1432 = vmatpush3.bf16.msra.mxu0 %v1431_v8  ;;  %v1485_v8 = vpack.c.bf16 %v815_v33, %v814_v6  ;;  %v1451_v33 = vpack.c.bf16 %v765_v0, %v764_v1 }
  0x6a   :  { %1390 = vmatpush1.bf16.msra.mxu1 %v1389_v9  ;;  %1434 = vmatprep.subr.bf16.mxu0 %v1433_v11  ;;  %v798_v9 = vld [vmem:[%s2111_s5 + $0x220] sm:$0xff]  ;;  %v816_v11 = vld [vmem:[%s2111_s5 + $0x2b0] sm:$0xff] }
  0x6b   :  { %1392 = vmatprep.subr.bf16.mxu1 %v1391_v63  ;;  %v1487_v12 = vpack.c.bf16 %v799_v10, %v798_v9  ;;  %v800_v63 = vld [vmem:[%s2111_s5 + $0x230] sm:$0xff]  ;;  %v766_v10 = vld [vmem:[%s2111_s5 + $0x120] sm:$0xff] }
  0x6c   :  { %v1491_v17 = vpack.c.bf16 %v801_v14, %v800_v63 }
  0x6d   :  { %1436 = vmatpush3.bf16.msra.mxu0 %v1435_v19  ;;  %v802_v19 = vld [vmem:[%s2111_s5 + $0x240] sm:$0xff] }
  0x6e   :  { %1394 = vmatpush1.bf16.msra.mxu1 %v1393_v20  ;;  %1438 = vmatprep.subr.bf16.mxu0 %v1437_v21  ;;  %v803_v20 = vld [vmem:[%s2111_s5 + $0x248] sm:$0xff]  ;;  %v820_v21 = vld [vmem:[%s2111_s5 + $0x2d0] sm:$0xff] }
  0x6f   :  { %1396 = vmatprep.subr.bf16.mxu1 %v1395_v24  ;;  %v1495_v23 = vpack.c.bf16 %v803_v20, %v802_v19  ;;  %v1497_v24 = vpack.c.bf16 %v821_v22, %v820_v21  ;;  %v769_v19 = vld [vmem:[%s2111_s5 + $0x138] sm:$0xff]  ;;  %v786_v20 = vld [vmem:[%s2111_s5 + $0x1c0] sm:$0xff]  ;;  %v787_v21 = vld [vmem:[%s2111_s5 + $0x1c8] sm:$0xff] }
  0x71   :  { %1440 = vmatpush3.bf16.msra.mxu0 %v1439_v29  ;;  %v1499_v29 = vpack.c.bf16 %v805_v26, %v804_v25  ;;  %v771_v25 = vld [vmem:[%s2111_s5 + $0x148] sm:$0xff]  ;;  %v788_v26 = vld [vmem:[%s2111_s5 + $0x1d0] sm:$0xff] }
  0x72   :  { %1398 = vmatpush1.bf16.msra.mxu1 %v1397_v32  ;;  %1442 = vmatprep.subr.bf16.mxu0 %v1441_v34  ;;  %v807_v32 = vld [vmem:[%s2111_s5 + $0x268] sm:$0xff]  ;;  %v824_v34 = vld [vmem:[%s2111_s5 + $0x2f0] sm:$0xff] }
  0x73   :  { %1400 = vmatprep.subr.bf16.mxu1 %v1399_v37  ;;  %v1503_v36 = vpack.c.bf16 %v807_v32, %v806_v31  ;;  %v1505_v37 = vpack.c.bf16 %v825_v35, %v824_v34  ;;  %v773_v31 = vld [vmem:[%s2111_s5 + $0x158] sm:$0xff]  ;;  %v790_v32 = vld [vmem:[%s2111_s5 + $0x1e0] sm:$0xff]  ;;  %v791_v34 = vld [vmem:[%s2111_s5 + $0x1e8] sm:$0xff] }
  0x75   :  { %1444 = vmatpush3.bf16.msra.mxu0 %v1443_v42  ;;  %v1949_v42 = vshrl.u32 %v694_v41, 7 }
  0x76   :  { %1402 = vmatpush1.bf16.msra.mxu1 %v1401_v45  ;;  %1446 = vmatprep.subr.bf16.mxu0 %v1445_v46 }
  0x77   :  { %1404 = vmatprep.subr.bf16.mxu1 %v1403_v47  ;;  %v700_v43 = vsub.s32 1, %v1949_v42  ;;  %v696_v45 = vsub.s32 0, %v1949_v42  ;;  %v708_v47 = vsub.s32 3, %v1949_v42  ;;  %v712_v55 = vsub.s32 4, %v1949_v42 }
  0x79   :  { %v701_v46 = vrot.slane %v1955_v44, %v700_v43  ;;  %v697_v48 = vrot.slane %v1955_v44, %v696_v45  ;;  %v713_v6 = vrot.slane %v1955_v44, %v712_v55  ;;  %v704_v43 = vsub.s32 2, %v1949_v42 }
  0x7a   :  { %1406 = vmatpush1.bf16.msra.mxu1 %v1405_v52  ;;  %v780_v52 = vld [vmem:[%s2111_s5 + $0x190] sm:$0xff] }
  0x7b   :  { %1409 = vmatprep.subr.msk.bf16.mxu1 %vm1730_vm6, %v1407_v53  ;;  %v781_v53 = vld [vmem:[%s2111_s5 + $0x198] sm:$0xff]  ;;  %v705_v49 = vrot.slane %v1955_v44, %v704_v43 }
  0x7c   :  { %v1449_v62 = vpack.c.bf16 %v781_v53, %v780_v52 }
  0x7e   :  { %1412 = vmatpush1.bf16.msk.msra.mxu1 %vm1730_vm6, %v1410_v58  ;;  %v709_v58 = vrot.slane %v1955_v44, %v708_v47  ;;  %v777_v47 = vld [vmem:[%s2111_s5 + $0x178] sm:$0xff] }
  0x7f   :  { %1478 = vmatprep.subr.bf16.mxu1 %v1477_v59  ;;  %v716_v59 = vsub.s32 5, %v1949_v42 }
  0x81   :  { %686 = vmatmul.mubr.f32.vlgmr.msra.gmra.mrb[2].mxu1 %v1719_v61  ;;  %v817_v61 = vld [vmem:[%s2111_s5 + $0x2b8] sm:$0xff] }
  0x82   :  { %1480 = vmatpush3.bf16.msra.mxu1 %v1479_v2  ;;  %v1489_v13 = vpack.c.bf16 %v817_v61, %v816_v11  ;;  %v782_v2 = vld [vmem:[%s2111_s5 + $0x1a0] sm:$0xff]  ;;  %v767_v11 = vld [vmem:[%s2111_s5 + $0x128] sm:$0xff]  ;;  %v784_v61 = vld [vmem:[%s2111_s5 + $0x1b0] sm:$0xff] }
  0x83   :  { %1482 = vmatprep.subr.bf16.mxu1 %v1481_v3  ;;  %v783_v3 = vld [vmem:[%s2111_s5 + $0x1a8] sm:$0xff]  ;;  %v1455_v15 = vpack.c.bf16 %v767_v11, %v766_v10 }
  0x84   :  { %v1453_v9 = vpack.c.bf16 %v783_v3, %v782_v2 }
  0x86   :  { %1484 = vmatpush3.bf16.msra.mxu1 %v1483_v7 }
  0x87   :  { %1486 = vmatprep.subr.bf16.mxu1 %v1485_v8  ;;  %v717_v8 = vrot.slane %v1955_v44, %v716_v59 }
  0x8a   :  { %1488 = vmatpush3.bf16.msra.mxu1 %v1487_v12  ;;  %v785_v12 = vld [vmem:[%s2111_s5 + $0x1b8] sm:$0xff] }
  0x8b   :  { %1490 = vmatprep.subr.bf16.mxu1 %v1489_v13 }
  0x8e   :  { %1492 = vmatpush3.bf16.msra.mxu1 %v1491_v17  ;;  %v1457_v17 = vpack.c.bf16 %v785_v12, %v784_v61 }
  0x8f   :  { %1494 = vmatprep.subr.bf16.mxu1 %v1493_v18  ;;  %v768_v18 = vld [vmem:[%s2111_s5 + $0x130] sm:$0xff] }
  0x90   :  { %v1459_v22 = vpack.c.bf16 %v769_v19, %v768_v18 }
  0x92   :  { %1496 = vmatpush3.bf16.msra.mxu1 %v1495_v23  ;;  %v1461_v23 = vpack.c.bf16 %v787_v21, %v786_v20 }
  0x93   :  { %1498 = vmatprep.subr.bf16.mxu1 %v1497_v24  ;;  %v770_v24 = vld [vmem:[%s2111_s5 + $0x140] sm:$0xff] }
  0x94   :  { %v1463_v28 = vpack.c.bf16 %v771_v25, %v770_v24 }
  0x96   :  { %1500 = vmatpush3.bf16.msra.mxu1 %v1499_v29  ;;  %v1465_v29 = vpack.c.bf16 %v789_v27, %v788_v26 }
  0x97   :  { %1502 = vmatprep.subr.bf16.mxu1 %v1501_v30  ;;  %v772_v30 = vld [vmem:[%s2111_s5 + $0x150] sm:$0xff] }
  0x98   :  { %v1467_v35 = vpack.c.bf16 %v773_v31, %v772_v30 }
  0x9a   :  { %1504 = vmatpush3.bf16.msra.mxu1 %v1503_v36  ;;  %v1469_v36 = vpack.c.bf16 %v791_v34, %v790_v32 }
  0x9b   :  { %1506 = vmatprep.subr.bf16.mxu1 %v1505_v37  ;;  %v774_v37 = vld [vmem:[%s2111_s5 + $0x160] sm:$0xff] }
  0x9c   :  { %v1471_v41 = vpack.c.bf16 %v775_v38, %v774_v37 }
  0x9e   :  { %1508 = vmatpush3.bf16.msra.mxu1 %v1507_v40  ;;  %v793_v40 = vld [vmem:[%s2111_s5 + $0x1f8] sm:$0xff] }
  0x9f   :  { %v1473_v45 = vpack.c.bf16 %v793_v40, %v792_v39 }
  0xef   :  { %v143_v51 = vpop.f32.mrb[0].mxu0 }
  0xf0   :  { %v145_v54 = vpop.f32.mrb[1].mxu0  ;;  %v1978_v60 = vadd.f32 %v697_v48, %v143_v51  ;;  %v1594_v51 = vmov 1983009808  }
  0xf1   :  { %v1974_v56 = vadd.f32 %v701_v46, %v145_v54  ;;  %v776_v46 = vld [vmem:[%s2111_s5 + $0x170] sm:$0xff]  ;;  %v1053_v52 = vunpack.c.l.s4 %v1594_v51  ;;  %s1595_s5 = smov [#allocation5]  }
  0xf2   :  { %v1475_v48 = vpack.c.bf16 %v777_v47, %v776_v46  ;;  %s1085_s4 = sshll.u32 %s1595_s5, 4  ;;  %s1086_s4 = int_to_ptr.vmem [resolvable:$true] %s1085_s4 }
  0xf3   :  { %890 = vmatprep.mubr.f32.mxu0 %v1974_v56  ;;  %v1993_v4 = vpop.f32.mrb[2].mxu0  ;;  %v1054_v53 = vunpack.c.0.s8 %v1053_v52  ;;  %s1539_s2 = scalar_lea.vmem %s1086_s4, 192  ;;  %p1544_p9 = scmp.lt.s32.totalorder %s1086_s4, %s1086_s4 }
  0xf4   :  { %891 = vmatmul.mubr.f32.vlgmr.msra.gmra.mrb[8].mxu0 %v1978_v60  ;;  %v216_v5 = vpop.f32.mrb[3].mxu0  ;;  %v726_v50 = vadd.f32 %v705_v49, %v1993_v4  ;;  %p1540_p8 = scmp.ne.s32.totalorder %s1086_s4, %s1539_s2  ;;  %p1545_p10 = scmp.lt.s32.totalorder %s1539_s2, %s1539_s2 }
  0xf5   :  { %1448 = vmatpush3.bf16.msra.mxu0 %v1447_v57  ;;  %v1997_v7 = vadd.f32 %v709_v58, %v216_v5  ;;  %v1057_v59 = vsub.s32 %v1054_v53, %v1949_v42 }
  0xf6   :  { %1450 = vmatprep.subr.bf16.mxu0 %v1449_v62  ;;  %p1546_p11 = por %p1545_p10, %p1544_p9 }
  0xf7   :  { %v285_v13 = vpop.f32.mrb[4].mxu0  ;;  %960 = vmatprep.mubr.f32.mxu0 %v1997_v7 }
  0xf8   :  { %v2013_v63 = vadd.f32 %v713_v6, %v285_v13  ;;  %v287_v14 = vpop.f32.mrb[5].mxu0  ;;  %p1547_p12 = pnand %p1546_p11, %p1540_p8 }
  0xf9   :  { %1452 = vmatpush3.bf16.msra.mxu0 %v1451_v33  ;;  %v2015_v16 = vadd.f32 %v717_v8, %v287_v14 }
  0xfa   :  { %1454 = vmatprep.subr.bf16.mxu0 %v1453_v9 }
  0xfb   :  { %1030 = vmatprep.mubr.f32.mxu1 %v2015_v16 }
  0xfc   :  { %1031 = vmatmul.mubr.f32.vlgmr.msra.gmra.mrb[4].mxu1 %v2013_v63 }
  0xfd   :  { %1456 = vmatpush3.bf16.msra.mxu0 %v1455_v15 }
  0xfe   :  { %1458 = vmatprep.subr.bf16.mxu0 %v1457_v17 }
 0x101   :  { %1460 = vmatpush3.bf16.msra.mxu0 %v1459_v22 }
 0x102   :  { %1462 = vmatprep.subr.bf16.mxu0 %v1461_v23 }
 0x105   :  { %1464 = vmatpush3.bf16.msra.mxu0 %v1463_v28 }
 0x106   :  { %1466 = vmatprep.subr.bf16.mxu0 %v1465_v29 }
 0x109   :  { %1468 = vmatpush3.bf16.msra.mxu0 %v1467_v35 }
 0x10a   :  { %1470 = vmatprep.subr.bf16.mxu0 %v1469_v36 }
 0x10d   :  { %1472 = vmatpush3.bf16.msra.mxu0 %v1471_v41 }
 0x10e   :  { %1474 = vmatprep.subr.bf16.mxu0 %v1473_v45 }
 0x111   :  { %1476 = vmatpush3.bf16.msra.mxu0 %v1475_v48 }
 0x114   :  { %961 = vmatmul.mubr.f32.vlgmr.msra.gmra.mrb[10].mxu0 %v726_v50 }
 0x120   :  { %v545_v54 = vpop.f32.mrb[0].mxu1 }
 0x121   :  { %v1038_v55 = vadd.f32 %v1978_v60, %v545_v54  ;;  %v547_v57 = vpop.f32.mrb[1].mxu1 }
 0x122   :  { %v1039_v58 = vadd.f32 %v1974_v56, %v547_v57 }
 0x124   :  { %v1050_v62 = vcombine.low %v1038_v55, %v1039_v58 }
 0x126   :  { %v1058_v1 = vrot.slane %v1050_v62, %v1057_v59 }
 0x12b   :  { %v616_v0 = vpop.f32.mrb[6].mxu0 }
 0x12c   :  { %v1040_v44 = vadd.f32 %v726_v50, %v616_v0  ;;  %v618_v2 = vpop.f32.mrb[7].mxu0 }
 0x12d   :  { %v1041_v3 = vadd.f32 %v1997_v7, %v618_v2 }
 0x12f   :  { %v1051_v4 = vcombine.low %v1040_v44, %v1041_v3 }
 0x131   :  { %v1065_v5 = vrot.slane %v1051_v4, %v1057_v59 }
 0x133   :  { %v1066_v6 = vcombine.low %v1058_v1, %v1065_v5 }
 0x135   :  { %1077 = vst [vmem:[#allocation5] sm:$0xff] %v1066_v6 }
 0x154   :  { %v687_v33 = vpop.f32.mrb[2].mxu1 }
 0x155   :  { %v1042_v8 = vadd.f32 %v2013_v63, %v687_v33  ;;  %v689_v60 = vpop.f32.mrb[3].mxu1 }
 0x156   :  { %v1043_v9 = vadd.f32 %v2015_v16, %v689_v60 }
 0x158   :  { %v1067_v56 = vcombine.low %v1042_v8, %v1043_v9 }
 0x15a   :  { %1127 = vst.sshfl [vmem:[#allocation5 + $0x8] sm:$0x33 pattern:$0x76325410] %v1067_v56 }
 0x15b   :  { %1550 = shalt.err (!%p1547_p12)
}
 0x15c   :  { %s1551_s21 = scalar_lea.hbm %s2112_s6, 192 }
 0x15d   :  { %p1552_p13 = scmp.ne.s32.totalorder %s2112_s6, %s1551_s21  ;;  %p1555_p0 = scmp.lt.u32.totalorder %s1551_s21, %s2112_s6 }
 0x15f   :  { %p1557_p1 = pnand %p1555_p0, %p1552_p13 }
 0x161   :  { %1560 = shalt.err (!%p1557_p1)
}
 0x162   :  { %1088 = dma.vmem_to_hbm [thread:$0]  %s1086_s4, 192, %s2112_s6, [#allocation4]   ;;  %vm1036_vm7 = vcmask 582656  }
 0x163   :  { %s1596_s0 = smov [#allocation6]  }
 0x164   :  { %s1095_s28 = sshll.u32 %s1596_s0, 4  ;;  %s1096_s28 = int_to_ptr.vmem [resolvable:$true] %s1095_s28 }
 0x165   :  { %s1561_s29 = scalar_lea.vmem %s1096_s28, 32  ;;  %p1566_p3 = scmp.lt.s32.totalorder %s1096_s28, %s1096_s28 }
 0x166   :  { %p1562_p2 = scmp.ne.s32.totalorder %s1096_s28, %s1561_s29  ;;  %p1567_p4 = scmp.lt.s32.totalorder %s1561_s29, %s1561_s29 }
 0x168   :  { %p1568_p5 = por %p1567_p4, %p1566_p3 }
 0x16a   :  { %p1569_p6 = pnand %p1568_p5, %p1562_p2 }
 0x1c7   :  { %v1160_v42 = vpop.f32.mrb[8].mxu0 }
 0x1c8   :  { %v1161_v7 = vpop.f32.mrb[9].mxu0 }
 0x1c9   :  { %v1162_v10 = vadd.f32 %v1161_v7, %v1160_v42 }
 0x1cf   :  { %v1230_v11 = vpop.f32.mrb[4].mxu1 }
 0x1d0   :  { %v1231_v61 = vpop.f32.mrb[5].mxu1 }
 0x1d1   :  { %v1232_v12 = vadd.f32 %v1231_v61, %v1230_v11 }
 0x1e7   :  { %v1195_v13 = vpop.f32.mrb[10].mxu0 }
 0x1e8   :  { %v1196_v63 = vpop.f32.mrb[11].mxu0 }
 0x1e9   :  { %v1197_v14 = vadd.f32 %v1196_v63, %v1195_v13 }
 0x1eb   :  { %v963_v15 = vadd.f32 %v1197_v14, %v1162_v10 }
 0x1ed   :  { %v1033_v16 = vadd.f32 %v1232_v12, %v963_v15 }
 0x1ef   :  { %1037 = vst.msk [vmem:[#allocation6] sm:$0x3] %vm1036_vm7, %v1033_v16 }
 0x1f0   :  { %1572 = shalt.err (!%p1569_p6)
}
 0x1f1   :  { %s1573_s8 = scalar_lea.hbm %s2113_s7, 32 }
 0x1f2   :  { %p1574_p7 = scmp.ne.s32.totalorder %s2113_s7, %s1573_s8  ;;  %p1577_p8 = scmp.lt.u32.totalorder %s1573_s8, %s2113_s7 }
 0x1f4   :  { %p1579_p9 = pnand %p1577_p8, %p1574_p7 }
 0x1f6   :  { %1582 = shalt.err (!%p1579_p9)
}
 0x1f7   :  { %1098 = dma.vmem_to_hbm [thread:$0]  %s1096_s28, 32, %s2113_s7, [#allocation7]  }
 0x1f8   :  { %1585 = dma.done.wait [#allocation4], 192  }
 0x1f9   :  { %1586 = vsyncadd [#allocation4], 4294967104 }
 0x1fa   :  { %1587 = dma.done.wait [#allocation7], 32  }
 0x1fb   :  { %1588 = vsyncadd [#allocation7], 4294967264 }
 0x1fc   :  { %1105 = vsyncpa [#allocation3], 1 }
 0x1fd   :  { %1106 = vsyncpa [#allocation4], 1 }
 0x1fe   :  { %1107 = vsyncpa [#allocation7], 1 }

</bundles_post_ra>
